<compile_context>
chip_gen: v6e
topology: v6e:2x2x1
jax: 0.10.0
libtpu: 0.0.40
codegen_flags: <defaults>
</compile_context>

<pallas_src>
import jax
import jax.numpy as jnp
from jax import lax
from jax.experimental import pallas as pl
from jax.experimental.pallas import tpu as pltpu

EPS = 1e-5


# ----------------------------------------------------------------------------
# Kernel: single invocation; every tensor is 2-D (H, lanes), lane-dense.
# ----------------------------------------------------------------------------
def _bottleneck_kernel(x_ref, sbw_ref, sbn_ref, w1_ref, w2_ref, w3_ref, o_ref):
    xs = x_ref[...]                                   # (H, B*W*Cin), f32
    H = xs.shape[0]
    mm = w1_ref.dtype                                 # bf16 or f32 (set by packer)

    s1 = sbw_ref[0:1, :]                              # (1, B*W*Cin)
    b1 = sbw_ref[1:2, :]
    cb3 = sbw_ref[2:3, :]
    cb1 = sbn_ref[0:1, :]                             # (1, B*W*planes)
    cb2 = sbn_ref[1:2, :]

    # ---- bn1 + relu (single lane-dense VPU pass, f32) -----------------------
    y = jnp.maximum(xs * s1 + b1, 0.0)

    # ---- conv1 (1x1, bn2 folded): block-diagonal matmul + relu --------------
    y = jnp.dot(y.astype(mm), w1_ref[...],
                preferred_element_type=jnp.float32) + cb1
    y = jnp.maximum(y, 0.0)                           # (H, B*W*planes), f32

    # ---- conv2 (3x3, stride=1, pad=1, bn3 folded): ONE K-stacked matmul -----
    # kx taps + W-direction zero padding live inside the banded weights; the
    # H-direction shifts are XLU rolls with a boundary-row zero mask, and the
    # three ky operands are lane-concatenated so a single dot does the sum.
    rows = lax.broadcasted_iota(jnp.int32, (H, 1), 0)
    y_km1 = jnp.where(rows == 0, 0.0, pltpu.roll(y, 1, axis=0))          # in[h-1]
    y_kp1 = jnp.where(rows == H - 1, 0.0, pltpu.roll(y, H - 1, axis=0))  # in[h+1]
    y_cat = jnp.concatenate([y_km1, y, y_kp1], axis=1).astype(mm)        # (H, 3*B*W*planes)
    y = jnp.dot(y_cat, w2_ref[...], preferred_element_type=jnp.float32) + cb2
    y = jnp.maximum(y, 0.0).astype(mm)

    # ---- conv3 (1x1): block-diagonal matmul + bias + identity residual ------
    y = jnp.dot(y, w3_ref[...], preferred_element_type=jnp.float32) + cb3
    o_ref[...] = y + xs                               # (H, B*W*cout), lane-dense store


# ----------------------------------------------------------------------------
# One-time parameter packing (hoisted out of the per-call path).
# ----------------------------------------------------------------------------
def _fold_bn(gamma, beta, mean, var):
    s = gamma / jnp.sqrt(var + EPS)
    return s, beta - mean * s


def pack_bottleneck_params(params, B, W, matmul_dtype=jnp.bfloat16):
    """Fold BN2/BN3 + biases into conv weights and kron-pack (B, W) into lanes."""
    Cin, planes = params["w1"].shape
    cout = params["w3"].shape[1]
    assert Cin == cout, "identity residual (downsample=None) requires inplanes == 2*planes"

    s1, b1 = _fold_bn(params["bn1_g"], params["bn1_b"], params["bn1_m"], params["bn1_v"])
    s2, b2 = _fold_bn(params["bn2_g"], params["bn2_b"], params["bn2_m"], params["bn2_v"])
    s3, b3 = _fold_bn(params["bn3_g"], params["bn3_b"], params["bn3_m"], params["bn3_v"])

    w1f = params["w1"] * s2[None, :]                      # (Cin, planes)     bn2 folded
    cb1f = params["cb1"] * s2 + b2
    w2f = params["w2"] * s3[None, None, None, :]          # (3,3,planes,planes) bn3 folded
    cb2f = params["cb2"] * s3 + b3
    w3f = params["w3"]                                    # (planes, cout)
    cb3f = params["cb3"]

    # 1x1 convs: block-diagonal over (B, W).
    eye_bw = jnp.eye(B * W, dtype=jnp.float32)
    w1p = jnp.kron(eye_bw, w1f)                           # (B*W*Cin,    B*W*planes)
    w3p = jnp.kron(eye_bw, w3f)                           # (B*W*planes, B*W*cout)

    # 3x3 conv: per ky, a banded (W*planes, W*planes) matrix holding the 3 kx
    # taps (W padding implicit), block-diagonal over B, then K-stacked over ky.
    eye_b = jnp.eye(B, dtype=jnp.float32)
    bands = []
    for ky in range(3):
        band_w = sum(jnp.kron(jnp.eye(W, k=1 - kx, dtype=jnp.float32), w2f[ky, kx])
                     for kx in range(3))                  # (W*planes, W*planes)
        bands.append(jnp.kron(eye_b, band_w))             # (B*W*planes, B*W*planes)
    w2s = jnp.concatenate(bands, axis=0)                  # (3*B*W*planes, B*W*planes)

    nbw = B * W
    sbw = jnp.stack([jnp.tile(s1, nbw), jnp.tile(b1, nbw), jnp.tile(cb3f, nbw)], axis=0)
    sbn = jnp.stack([jnp.tile(cb1f, nbw), jnp.tile(cb2f, nbw)], axis=0)

    md = matmul_dtype
    return dict(sbw=sbw.astype(jnp.float32),              # (3, B*W*Cin)
                sbn=sbn.astype(jnp.float32),              # (2, B*W*planes)
                w1p=w1p.astype(md), w2s=w2s.astype(md), w3p=w3p.astype(md),
                B=B, W=W, Cin=Cin, planes=planes, cout=cout)


# ----------------------------------------------------------------------------
# Forward wrapper (per-call path: only layout transpose + one pallas_call).
# ----------------------------------------------------------------------------
def bottleneck_forward(x_nchw, packed, stride=1):
    B, Cin, H, W = x_nchw.shape
    assert stride == 1, "downsample=None requires stride=1"
    # TODO(synk): stride != 1 / downsample != None path not implemented.
    assert B == packed["B"] and W == packed["W"] and Cin == packed["Cin"]
    planes, cout = packed["planes"], packed["cout"]
    nin, nmid, nout = B * W * Cin, B * W * planes, B * W * cout

    # NCHW -> (H, B, W, Cin) -> (H, B*W*Cin). HBM-side transpose; disappears if
    # the surrounding graph were already channel-last.
    x2d = jnp.transpose(x_nchw, (2, 0, 3, 1)).astype(jnp.float32).reshape(H, nin)

    ins = (x2d, packed["sbw"], packed["sbn"], packed["w1p"], packed["w2s"], packed["w3p"])
    # Packed-dim MXU FLOPs (what the hardware actually executes).
    flops = int(2 * H * (nin * nmid + 3 * nmid * nmid + nmid * nout))
    bytes_accessed = int(sum(int(a.size) * a.dtype.itemsize for a in ins) + H * nout * 4)

    out2d = pl.pallas_call(
        _bottleneck_kernel,
        out_shape=jax.ShapeDtypeStruct((H, nout), jnp.float32),
        cost_estimate=pl.CostEstimate(flops=flops, transcendentals=0,
                                      bytes_accessed=bytes_accessed),
    )(*ins)

    out = out2d.reshape(H, B, W, cout)
    return jnp.transpose(out, (1, 3, 0, 2))               # -> NCHW


# ----------------------------------------------------------------------------
# Pure-JAX reference (inference-mode BN), NCHW in/out.
# ----------------------------------------------------------------------------
def bottleneck_ref(x_nchw, params, stride=1):
    x = jnp.transpose(x_nchw, (0, 2, 3, 1)).astype(jnp.float32)

    def bn(y, g, b, m, v):
        return (y - m) / jnp.sqrt(v + EPS) * g + b

    y = jax.nn.relu(bn(x, params["bn1_g"], params["bn1_b"], params["bn1_m"], params["bn1_v"]))
    y = jnp.einsum("bhwc,cd->bhwd", y, params["w1"]) + params["cb1"]
    y = jax.nn.relu(bn(y, params["bn2_g"], params["bn2_b"], params["bn2_m"], params["bn2_v"]))
    y = lax.conv_general_dilated(y, params["w2"], (stride, stride), ((1, 1), (1, 1)),
                                 dimension_numbers=("NHWC", "HWIO", "NHWC")) + params["cb2"]
    y = jax.nn.relu(bn(y, params["bn3_g"], params["bn3_b"], params["bn3_m"], params["bn3_v"]))
    y = jnp.einsum("bhwc,cd->bhwd", y, params["w3"]) + params["cb3"]
    y = y + x
    return jnp.transpose(y, (0, 3, 1, 2))


def init_params(key, inplanes, planes):
    ks = jax.random.split(key, 16)
    u = lambda k, shape, lo=-0.5, hi=0.5: jax.random.uniform(k, shape, jnp.float32, lo, hi)
    return dict(
        bn1_g=u(ks[0], (inplanes,), 0.5, 1.5), bn1_b=u(ks[1], (inplanes,)),
        bn1_m=u(ks[2], (inplanes,)),           bn1_v=u(ks[3], (inplanes,), 0.5, 1.5),
        bn2_g=u(ks[4], (planes,), 0.5, 1.5),   bn2_b=u(ks[5], (planes,)),
        bn2_m=u(ks[6], (planes,)),             bn2_v=u(ks[7], (planes,), 0.5, 1.5),
        bn3_g=u(ks[8], (planes,), 0.5, 1.5),   bn3_b=u(ks[9], (planes,)),
        bn3_m=u(ks[10], (planes,)),            bn3_v=u(ks[11], (planes,), 0.5, 1.5),
        w1=u(ks[12], (inplanes, planes)),      cb1=u(ks[13], (planes,)),
        w2=u(ks[14], (3, 3, planes, planes)),  cb2=u(ks[15], (planes,)),
        w3=u(jax.random.fold_in(key, 99), (planes, 2 * planes)),
        cb3=u(jax.random.fold_in(key, 100), (2 * planes,)),
    )


if __name__ == "__main__":
    B, inplanes, planes, H, W = 2, 8, 4, 16, 16   # inplanes == 2*planes (identity residual)
    key = jax.random.PRNGKey(0)
    kx_, kp = jax.random.split(key)
    x = jax.random.normal(kx_, (B, inplanes, H, W), dtype=jnp.float32)   # NCHW, like PyTorch
    params = init_params(kp, inplanes, planes)

    ref = bottleneck_ref(x, params, stride=1)

    # f32 matmuls: tight check against the pure-JAX reference.
    packed_f32 = pack_bottleneck_params(params, B, W, matmul_dtype=jnp.float32)
    out_f32 = jax.block_until_ready(bottleneck_forward(x, packed_f32, stride=1))
    assert out_f32.shape == (B, 2 * planes, H, W)
    assert jnp.allclose(out_f32, ref, rtol=1e-3, atol=1e-3), \
        float(jnp.max(jnp.abs(out_f32 - ref)))

    # bf16 matmul operands with f32 accumulation: looser numeric check.
    packed_bf16 = pack_bottleneck_params(params, B, W, matmul_dtype=jnp.bfloat16)
    out_bf16 = jax.block_until_ready(bottleneck_forward(x, packed_bf16, stride=1))
    assert out_bf16.shape == (B, 2 * planes, H, W)
    assert jnp.allclose(out_bf16, ref, rtol=5e-2, atol=1e-1), \
        float(jnp.max(jnp.abs(out_bf16 - ref)))

    print("KERNEL_OK")
</pallas_src>

<mosaic_0001>
module attributes {stable_mosaic.version = 11 : i64} {
  func.func @_bottleneck_kernel(%arg0: memref<16x256xf32, #tpu.memory_space<vmem>>, %arg1: memref<3x256xf32, #tpu.memory_space<vmem>>, %arg2: memref<2x128xf32, #tpu.memory_space<vmem>>, %arg3: memref<256x128xf32, #tpu.memory_space<vmem>>, %arg4: memref<384x128xf32, #tpu.memory_space<vmem>>, %arg5: memref<128x256xf32, #tpu.memory_space<vmem>>, %arg6: memref<16x256xf32, #tpu.memory_space<vmem>>) attributes {dimension_semantics = [], scalar_prefetch = 0 : i64, scratch_operands = 0 : i64, tpu.core_type = #tpu.core_type<tc>} {
    %c0 = arith.constant 0 : index
    %c0_0 = arith.constant 0 : index
    %0 = vector.load %arg0[%c0, %c0_0] : memref<16x256xf32, #tpu.memory_space<vmem>>, vector<16x256xf32>
    %c0_1 = arith.constant 0 : index
    %c0_2 = arith.constant 0 : index
    %1 = vector.load %arg1[%c0_1, %c0_2] : memref<3x256xf32, #tpu.memory_space<vmem>>, vector<1x256xf32>
    %c1 = arith.constant 1 : index
    %c0_3 = arith.constant 0 : index
    %2 = vector.load %arg1[%c1, %c0_3] : memref<3x256xf32, #tpu.memory_space<vmem>>, vector<1x256xf32>
    %c2 = arith.constant 2 : index
    %c0_4 = arith.constant 0 : index
    %3 = vector.load %arg1[%c2, %c0_4] : memref<3x256xf32, #tpu.memory_space<vmem>>, vector<1x256xf32>
    %c0_5 = arith.constant 0 : index
    %c0_6 = arith.constant 0 : index
    %4 = vector.load %arg2[%c0_5, %c0_6] : memref<2x128xf32, #tpu.memory_space<vmem>>, vector<1x128xf32>
    %c1_7 = arith.constant 1 : index
    %c0_8 = arith.constant 0 : index
    %5 = vector.load %arg2[%c1_7, %c0_8] : memref<2x128xf32, #tpu.memory_space<vmem>>, vector<1x128xf32>
    %6 = vector.broadcast %1 : vector<1x256xf32> to vector<16x256xf32>
    %7 = arith.mulf %0, %6 : vector<16x256xf32>
    %8 = vector.broadcast %2 : vector<1x256xf32> to vector<16x256xf32>
    %9 = arith.addf %7, %8 : vector<16x256xf32>
    %cst = arith.constant 0.000000e+00 : f32
    %10 = vector.broadcast %cst : f32 to vector<16x256xf32>
    %11 = arith.maximumf %9, %10 : vector<16x256xf32>
    %c0_9 = arith.constant 0 : index
    %c0_10 = arith.constant 0 : index
    %12 = vector.load %arg3[%c0_9, %c0_10] : memref<256x128xf32, #tpu.memory_space<vmem>>, vector<256x128xf32>
    %cst_11 = arith.constant dense<0.000000e+00> : vector<16x128xf32>
    %13 = tpu.matmul %11, %12, %cst_11 {dimension_numbers = #tpu.dot_dimension_numbers<[1], [0], [0], [1], [0, 0, 1, 1], [], []>} : vector<16x256xf32>, vector<256x128xf32>, vector<16x128xf32> -> vector<16x128xf32>
    %14 = vector.broadcast %4 : vector<1x128xf32> to vector<16x128xf32>
    %15 = arith.addf %13, %14 : vector<16x128xf32>
    %cst_12 = arith.constant 0.000000e+00 : f32
    %16 = vector.broadcast %cst_12 : f32 to vector<16x128xf32>
    %17 = arith.maximumf %15, %16 : vector<16x128xf32>
    %18 = tpu.iota {dimensions = array<i32: 0>} : vector<16x1xi32>
    %c0_i32 = arith.constant 0 : i32
    %19 = vector.broadcast %c0_i32 : i32 to vector<16x1xi32>
    %20 = arith.cmpi eq, %18, %19 : vector<16x1xi32>
    %c1_i32 = arith.constant 1 : i32
    %21 = tpu.dynamic_rotate %17 by %c1_i32 dim 0 : vector<16x128xf32>, i32 -> vector<16x128xf32>
    %cst_13 = arith.constant 0.000000e+00 : f32
    %22 = vector.shape_cast %20 : vector<16x1xi1> to vector<16x1xi1>
    %23 = vector.broadcast %22 : vector<16x1xi1> to vector<16x128xi1>
    %24 = vector.broadcast %cst_13 : f32 to vector<16x128xf32>
    %25 = arith.select %23, %24, %21 : vector<16x128xi1>, vector<16x128xf32>
    %c15_i32 = arith.constant 15 : i32
    %26 = vector.broadcast %c15_i32 : i32 to vector<16x1xi32>
    %27 = arith.cmpi eq, %18, %26 : vector<16x1xi32>
    %c15_i32_14 = arith.constant 15 : i32
    %28 = tpu.dynamic_rotate %17 by %c15_i32_14 dim 0 : vector<16x128xf32>, i32 -> vector<16x128xf32>
    %cst_15 = arith.constant 0.000000e+00 : f32
    %29 = vector.shape_cast %27 : vector<16x1xi1> to vector<16x1xi1>
    %30 = vector.broadcast %29 : vector<16x1xi1> to vector<16x128xi1>
    %31 = vector.broadcast %cst_15 : f32 to vector<16x128xf32>
    %32 = arith.select %30, %31, %28 : vector<16x128xi1>, vector<16x128xf32>
    %33 = tpu.concatenate %25, %17, %32 in 1 : vector<16x128xf32>, vector<16x128xf32>, vector<16x128xf32> -> vector<16x384xf32>
    %c0_16 = arith.constant 0 : index
    %c0_17 = arith.constant 0 : index
    %34 = vector.load %arg4[%c0_16, %c0_17] : memref<384x128xf32, #tpu.memory_space<vmem>>, vector<384x128xf32>
    %cst_18 = arith.constant dense<0.000000e+00> : vector<16x128xf32>
    %35 = tpu.matmul %33, %34, %cst_18 {dimension_numbers = #tpu.dot_dimension_numbers<[1], [0], [0], [1], [0, 0, 1, 1], [], []>} : vector<16x384xf32>, vector<384x128xf32>, vector<16x128xf32> -> vector<16x128xf32>
    %36 = vector.broadcast %5 : vector<1x128xf32> to vector<16x128xf32>
    %37 = arith.addf %35, %36 : vector<16x128xf32>
    %cst_19 = arith.constant 0.000000e+00 : f32
    %38 = vector.broadcast %cst_19 : f32 to vector<16x128xf32>
    %39 = arith.maximumf %37, %38 : vector<16x128xf32>
    %c0_20 = arith.constant 0 : index
    %c0_21 = arith.constant 0 : index
    %40 = vector.load %arg5[%c0_20, %c0_21] : memref<128x256xf32, #tpu.memory_space<vmem>>, vector<128x256xf32>
    %cst_22 = arith.constant dense<0.000000e+00> : vector<16x256xf32>
    %41 = tpu.matmul %39, %40, %cst_22 {dimension_numbers = #tpu.dot_dimension_numbers<[1], [0], [0], [1], [0, 0, 1, 1], [], []>} : vector<16x128xf32>, vector<128x256xf32>, vector<16x256xf32> -> vector<16x256xf32>
    %42 = vector.broadcast %3 : vector<1x256xf32> to vector<16x256xf32>
    %43 = arith.addf %41, %42 : vector<16x256xf32>
    %44 = arith.addf %43, %0 : vector<16x256xf32>
    %c0_23 = arith.constant 0 : index
    %c0_24 = arith.constant 0 : index
    %45 = vector.load %arg6[%c0_23, %c0_24] : memref<16x256xf32, #tpu.memory_space<vmem>>, vector<16x256xf32>
    tpu.vector_store %arg6[%c0_23, %c0_24], %44 {strides = array<i32>} : memref<16x256xf32, #tpu.memory_space<vmem>>, vector<16x256xf32>,
    return
  }
}

</mosaic_0001>

<bundles_post_ra>
// kernel: tpu_custom_call.1
= control target key start
LH: loop header
LB: loop body
LE: loop exit
PB: predicated region body
PF: predicated region fallthrough
CT: control target
= control target key end

     0   :  { %11 = vsyncpa [#allocation3], 0  ;;  %s1025_s0 = inlined_call_operand.hbm [shape: f32[16,256], index: 0, kind: input, shape index: {}]   ;;  %s1026_s1 = inlined_call_operand.hbm [shape: f32[3,256], index: 1, kind: input, shape index: {}]   ;;  %s1027_s2 = inlined_call_operand.vmem [shape: f32[2,128], index: 2, kind: input, shape index: {}]   ;;  %s1028_s3 = inlined_call_operand.hbm [shape: f32[256,128], index: 3, kind: input, shape index: {}]   ;;  %s1029_s4 = inlined_call_operand.hbm [shape: f32[384,128], index: 4, kind: input, shape index: {}]   ;;  %s1030_s5 = inlined_call_operand.hbm [shape: f32[128,256], index: 5, kind: input, shape index: {}]   ;;  %s1031_s6 = inlined_call_operand.hbm [shape: f32[16,256], index: 6, kind: output, shape index: {}]  }
   0x1   :  { %12 = vsyncpa [#allocation6], 0 }
   0x2   :  { %13 = vsyncpa [#allocation9], 0 }
   0x3   :  { %14 = vsyncpa [#allocation4], 0  ;;  %s904_s21 = smov [#allocation5]  }
   0x4   :  { %s33_s22 = sshll.u32 %s904_s21, 4  ;;  %s34_s22 = int_to_ptr.vmem [resolvable:$true] %s33_s22 }
   0x5   :  { %s784_s23 = scalar_lea.vmem %s34_s22, 128  ;;  %p789_p1 = scmp.lt.s32.totalorder %s34_s22, %s34_s22 }
   0x6   :  { %p785_p0 = scmp.ne.s32.totalorder %s34_s22, %s784_s23  ;;  %p790_p2 = scmp.lt.s32.totalorder %s784_s23, %s784_s23 }
   0x8   :  { %p791_p3 = por %p790_p2, %p789_p1 }
   0xa   :  { %p792_p4 = pnand %p791_p3, %p785_p0 }
   0xc   :  { %795 = shalt.err (!%p792_p4)
}
   0xd   :  { %36 = dma.hbm_to_vmem [thread:$0]  %s1026_s1, 128, %s34_s22, [#allocation6]  }
   0xe   :  { %s905_s26 = smov [#allocation8]   ;;  %s906_s28 = smov [#allocation2]  }
   0xf   :  { %s56_s27 = sshll.u32 %s905_s26, 4  ;;  %s20_s29 = sshll.u32 %s906_s28, 4  ;;  %s57_s27 = int_to_ptr.vmem [resolvable:$true] %s56_s27  ;;  %s21_s29 = int_to_ptr.vmem [resolvable:$true] %s20_s29 }
  0x10   :  { %s804_s30 = scalar_lea.vmem %s57_s27, 6144  ;;  %p809_p6 = scmp.lt.s32.totalorder %s57_s27, %s57_s27 }
  0x11   :  { %p805_p5 = scmp.ne.s32.totalorder %s57_s27, %s804_s30  ;;  %p810_p7 = scmp.lt.s32.totalorder %s804_s30, %s804_s30 }
  0x13   :  { %p811_p8 = por %p810_p7, %p809_p6 }
  0x15   :  { %p812_p9 = pnand %p811_p8, %p805_p5 }
  0x17   :  { %815 = shalt.err (!%p812_p9)
}
  0x18   :  { %s907_s7 = smov 128   ;;  %s908_s8 = smov 8  }
  0x19   :  { %62 = dma.hbm_to_vmem [thread:$0]  %s1029_s4, 6144, %s57_s27, [#allocation9], %s907_s7, %s907_s7, %s908_s8  }
  0x1a   :  { %s824_s1 = scalar_lea.vmem %s21_s29, 512  ;;  %p829_p11 = scmp.lt.s32.totalorder %s21_s29, %s21_s29 }
  0x1b   :  { %p825_p10 = scmp.ne.s32.totalorder %s21_s29, %s824_s1  ;;  %p830_p12 = scmp.lt.s32.totalorder %s824_s1, %s824_s1 }
  0x1d   :  { %p831_p13 = por %p830_p12, %p829_p11 }
  0x1f   :  { %p832_p0 = pnand %p831_p13, %p825_p10 }
  0x21   :  { %835 = shalt.err (!%p832_p0)
}
  0x22   :  { %s909_s11 = smov 256   ;;  %s910_s12 = smov 16  }
  0x23   :  { %26 = dma.hbm_to_vmem [thread:$0]  %s1025_s0, 512, %s21_s29, [#allocation3], %s909_s11, %s909_s11, %s910_s12  }
  0x24   :  { %s911_s15 = smov [#allocation7]   ;;  %s912_s4 = smov [#allocation10]  }
  0x25   :  { %s44_s16 = sshll.u32 %s911_s15, 4  ;;  %s68_s17 = sshll.u32 %s912_s4, 4  ;;  %s45_s16 = int_to_ptr.vmem [resolvable:$true] %s44_s16  ;;  %s69_s17 = int_to_ptr.vmem [resolvable:$true] %s68_s17 }
  0x26   :  { %s844_s18 = scalar_lea.vmem %s45_s16, 4096  ;;  %p849_p2 = scmp.lt.s32.totalorder %s45_s16, %s45_s16 }
  0x27   :  { %p845_p1 = scmp.ne.s32.totalorder %s45_s16, %s844_s18  ;;  %p850_p3 = scmp.lt.s32.totalorder %s844_s18, %s844_s18 }
  0x29   :  { %p851_p4 = por %p850_p3, %p849_p2 }
  0x2b   :  { %p852_p5 = pnand %p851_p4, %p845_p1 }
  0x2d   :  { %855 = shalt.err (!%p852_p5)
}
  0x2e   :  { %50 = dma.hbm_to_vmem [thread:$0]  %s1028_s3, 4096, %s45_s16, [#allocation6], %s907_s7, %s907_s7, %s908_s8  }
  0x2f   :  { %s864_s21 = scalar_lea.vmem %s69_s17, 4096  ;;  %p869_p7 = scmp.lt.s32.totalorder %s69_s17, %s69_s17 }
  0x30   :  { %p865_p6 = scmp.ne.s32.totalorder %s69_s17, %s864_s21  ;;  %p870_p8 = scmp.lt.s32.totalorder %s864_s21, %s864_s21 }
  0x32   :  { %p871_p9 = por %p870_p8, %p869_p7 }
  0x34   :  { %p872_p10 = pnand %p871_p9, %p865_p6 }
  0x36   :  { %875 = shalt.err (!%p872_p10)
}
  0x37   :  { %74 = dma.hbm_to_vmem [thread:$0]  %s1030_s5, 4096, %s69_s17, [#allocation9], %s909_s11, %s909_s11, %s910_s12  }
  0x38   :  { %896 = dma.done.wait [#allocation3], 512  }
  0x39   :  { %897 = vsyncadd [#allocation3], 4294966784 }
  0x3a   :  { %898 = dma.done.wait [#allocation6], 4224  }
  0x3b   :  { %899 = vsyncadd [#allocation6], 4294963072 }
  0x3c   :  { %900 = dma.done.wait [#allocation9], 10240  }
  0x3d   :  { %901 = vsyncadd [#allocation9], 4294957056  ;;  %v166_v0 = vld [vmem:[#allocation7 + $0xf8] sm:$0xff]  ;;  %v165_v2 = vld [vmem:[#allocation7 + $0xf0] sm:$0xff]  ;;  %v102_v3 = vlaneseq }
  0x3e   :  { %v150_v1 = vld [vmem:[#allocation7 + $0x78] sm:$0xff]  ;;  %636 = vmatprep.subr.mxu0 %v166_v0  ;;  %v149_v4 = vld [vmem:[#allocation7 + $0x70] sm:$0xff]  ;;  %v164_v5 = vld [vmem:[#allocation7 + $0xe8] sm:$0xff] }
  0x3f   :  { %637 = vmatpush3.msra.mxu0 %v150_v1  ;;  %v148_v6 = vld [vmem:[#allocation7 + $0x68] sm:$0xff]  ;;  %v163_v7 = vld [vmem:[#allocation7 + $0xe0] sm:$0xff]  ;;  %v971_v8 = vshrl.u32 %v102_v3, 7  ;;  %v162_v10 = vld [vmem:[#allocation7 + $0xd8] sm:$0xff] }
  0x40   :  { %638 = vmatprep.subr.mxu0 %v165_v2  ;;  %v147_v9 = vld [vmem:[#allocation7 + $0x60] sm:$0xff]  ;;  %v146_v11 = vld [vmem:[#allocation7 + $0x58] sm:$0xff]  ;;  %v161_v12 = vld [vmem:[#allocation7 + $0xd0] sm:$0xff] }
  0x41   :  { %639 = vmatpush3.msra.mxu0 %v149_v4  ;;  %v974_v13 = vsub.s32 1, %v971_v8  ;;  %v145_v14 = vld [vmem:[#allocation7 + $0x50] sm:$0xff]  ;;  %v160_v15 = vld [vmem:[#allocation7 + $0xc8] sm:$0xff]  ;;  %v976_v17 = vld [vmem:[#allocation2 + $0x8] sm:$0xff]  ;;  %v983_v24 = vsub.s32 0, %v971_v8  ;;  %vm255_vm0 = vcmp.lt.s32.totalorder %v971_v8, 1 }
  0x42   :  { %640 = vmatprep.subr.mxu0 %v164_v5  ;;  %v144_v16 = vld [vmem:[#allocation7 + $0x48] sm:$0xff]  ;;  %v94_v18 = vld [vmem:[#allocation5] ss:$4 sm:$0x3]  ;;  %v159_v20 = vld [vmem:[#allocation7 + $0xc0] sm:$0xff]  ;;  %vm634_vm1 = vcmp.ne.s32.totalorder %v971_v8, 0 }
  0x43   :  { %641 = vmatpush3.msra.mxu0 %v148_v6  ;;  %v96_v19 = vld [vmem:[#allocation5 + $0x1] ss:$4 sm:$0x3]  ;;  %v109_v21 = vrot.slane %v94_v18, %v974_v13  ;;  %v143_v23 = vld [vmem:[#allocation7 + $0x40] sm:$0xff]  ;;  %v307_v30 = vld [vmem:[#allocation8 + $0xf0] sm:$0xff]  ;;  %v105_v35 = vrot.slane %v94_v18, %v983_v24  ;;  %vm268_vm2 = vcmp.lt.s32.totalorder %v971_v8, 7 }
  0x44   :  { %642 = vmatprep.subr.mxu0 %v163_v7  ;;  %v980_v22 = vrot.slane %v96_v19, %v974_v13  ;;  %v308_v25 = vld [vmem:[#allocation8 + $0xf8] sm:$0xff]  ;;  %v157_v31 = vld [vmem:[#allocation7 + $0xb0] sm:$0xff]  ;;  %v156_v36 = vld [vmem:[#allocation7 + $0xa8] sm:$0xff]  ;;  %v120_v46 = vrot.slane %v96_v19, %v983_v24 }
  0x45   :  { %643 = vmatpush3.msra.mxu0 %v147_v9  ;;  %v158_v26 = vld [vmem:[#allocation7 + $0xb8] sm:$0xff]  ;;  %v113_v27 = vmul.f32 %v109_v21, %v976_v17  ;;  %674 = vmatprep.subr.mxu1 %v308_v25  ;;  %v291_v33 = vld [vmem:[#allocation8 + $0x70] sm:$0xff]  ;;  %v306_v39 = vld [vmem:[#allocation8 + $0xe8] sm:$0xff] }
  0x46   :  { %644 = vmatprep.subr.mxu0 %v162_v10  ;;  %v292_v28 = vld [vmem:[#allocation8 + $0x78] sm:$0xff]  ;;  %v141_v34 = vld [vmem:[#allocation7 + $0x30] sm:$0xff]  ;;  %v140_v40 = vld [vmem:[#allocation7 + $0x28] sm:$0xff] }
  0x47   :  { %645 = vmatpush3.msra.mxu0 %v146_v11  ;;  %v142_v29 = vld [vmem:[#allocation7 + $0x38] sm:$0xff]  ;;  %v128_v32 = vadd.f32 %v980_v22, %v113_v27  ;;  %675 = vmatpush3.msra.mxu1 %v292_v28  ;;  %v990_v41 = vld [vmem:[#allocation2 + $0x18] sm:$0xff]  ;;  %v290_v42 = vld [vmem:[#allocation8 + $0x68] sm:$0xff] }
  0x48   :  { %646 = vmatprep.subr.mxu0 %v161_v12  ;;  %v988_v38 = vld [vmem:[#allocation2] sm:$0xff]  ;;  %676 = vmatprep.subr.mxu1 %v307_v30  ;;  %v155_v43 = vld [vmem:[#allocation7 + $0xa0] sm:$0xff]  ;;  %v115_v50 = vmul.f32 %v109_v21, %v990_v41  ;;  %v995_v51 = vld [vmem:[#allocation2 + $0x10] sm:$0xff] }
  0x49   :  { %647 = vmatpush3.msra.mxu0 %v145_v14  ;;  %v132_v37 = vmax.f32 %v128_v32, 0.0  ;;  %677 = vmatpush3.msra.mxu1 %v291_v33  ;;  %v305_v44 = vld [vmem:[#allocation8 + $0xe0] sm:$0xff]  ;;  %v112_v47 = vmul.f32 %v105_v35, %v988_v38  ;;  %v154_v49 = vld [vmem:[#allocation7 + $0x98] sm:$0xff]  ;;  %v153_v55 = vld [vmem:[#allocation7 + $0x90] sm:$0xff]  ;;  %v114_v59 = vmul.f32 %v105_v35, %v995_v51 }
  0x4a   :  { %648 = vmatprep.subr.mxu0 %v160_v15  ;;  %v139_v45 = vld [vmem:[#allocation7 + $0x20] sm:$0xff]  ;;  %678 = vmatprep.subr.mxu1 %v306_v39  ;;  %v304_v52 = vld [vmem:[#allocation8 + $0xd8] sm:$0xff]  ;;  %v303_v56 = vld [vmem:[#allocation8 + $0xd0] sm:$0xff]  ;;  %v130_v62 = vadd.f32 %v980_v22, %v115_v50 }
  0x4b   :  { %649 = vmatpush3.msra.mxu0 %v144_v16  ;;  %235 = vmatprep.mubr.f32.mxu0 %v132_v37  ;;  %v289_v48 = vld [vmem:[#allocation8 + $0x60] sm:$0xff]  ;;  %v138_v53 = vld [vmem:[#allocation7 + $0x18] sm:$0xff]  ;;  %v137_v57 = vld [vmem:[#allocation7 + $0x10] sm:$0xff]  ;;  %v127_v58 = vadd.f32 %v120_v46, %v112_v47  ;;  %v129_v6 = vadd.f32 %v120_v46, %v114_v59 }
  0x4c   :  { %650 = vmatprep.subr.mxu0 %v159_v20  ;;  %679 = vmatpush3.msra.mxu1 %v290_v42  ;;  %v288_v54 = vld [vmem:[#allocation8 + $0x58] sm:$0xff]  ;;  %v287_v60 = vld [vmem:[#allocation8 + $0x50] sm:$0xff]  ;;  %v152_v61 = vld [vmem:[#allocation7 + $0x88] sm:$0xff]  ;;  %v134_v9 = vmax.f32 %v130_v62, 0.0 }
  0x4d   :  { %651 = vmatpush3.msra.mxu0 %v143_v23  ;;  %680 = vmatprep.subr.mxu1 %v305_v44  ;;  %v302_v63 = vld [vmem:[#allocation8 + $0xc8] sm:$0xff]  ;;  %v151_v2 = vld [vmem:[#allocation7 + $0x80] sm:$0xff]  ;;  %v131_v5 = vmax.f32 %v127_v58, 0.0  ;;  %v324_v10 = vld [vmem:[#allocation8 + $0x178] sm:$0xff]  ;;  %v133_v12 = vmax.f32 %v129_v6, 0.0 }
  0x4e   :  { %652 = vmatprep.subr.mxu0 %v158_v26  ;;  %681 = vmatpush3.msra.mxu1 %v289_v48  ;;  %v136_v0 = vld [vmem:[#allocation7 + $0x8] sm:$0xff]  ;;  %v301_v3 = vld [vmem:[#allocation8 + $0xc0] sm:$0xff]  ;;  %v323_v11 = vld [vmem:[#allocation8 + $0x170] sm:$0xff] }
  0x4f   :  { %653 = vmatpush3.msra.mxu0 %v142_v29  ;;  %682 = vmatprep.subr.mxu1 %v304_v52  ;;  %v286_v1 = vld [vmem:[#allocation8 + $0x48] sm:$0xff]  ;;  %v135_v4 = vld [vmem:[#allocation7] sm:$0xff]  ;;  %v320_v16 = vld [vmem:[#allocation8 + $0x158] sm:$0xff] }
  0x50   :  { %654 = vmatprep.subr.mxu0 %v157_v31  ;;  %683 = vmatpush3.msra.mxu1 %v288_v54  ;;  %v285_v7 = vld [vmem:[#allocation8 + $0x40] sm:$0xff]  ;;  %v322_v14 = vld [vmem:[#allocation8 + $0x168] sm:$0xff]  ;;  %v319_v18 = vld [vmem:[#allocation8 + $0x150] sm:$0xff] }
  0x51   :  { %655 = vmatpush3.msra.mxu0 %v141_v34  ;;  %684 = vmatprep.subr.mxu1 %v303_v56  ;;  %v321_v15 = vld [vmem:[#allocation8 + $0x160] sm:$0xff]  ;;  %v318_v19 = vld [vmem:[#allocation8 + $0x148] sm:$0xff]  ;;  %v300_v21 = vld [vmem:[#allocation8 + $0xb8] sm:$0xff] }
  0x52   :  { %656 = vmatprep.subr.mxu0 %v156_v36  ;;  %685 = vmatpush3.msra.mxu1 %v287_v60  ;;  %v317_v20 = vld [vmem:[#allocation8 + $0x140] sm:$0xff]  ;;  %v284_v22 = vld [vmem:[#allocation8 + $0x38] sm:$0xff]  ;;  %v299_v25 = vld [vmem:[#allocation8 + $0xb0] sm:$0xff]  ;;  %v250_v60 = vadd.s32 8, %v971_v8 }
  0x53   :  { %657 = vmatpush3.msra.mxu0 %v140_v40  ;;  %686 = vmatprep.subr.mxu1 %v302_v63  ;;  %v316_v23 = vld [vmem:[#allocation8 + $0x138] sm:$0xff]  ;;  %v283_v26 = vld [vmem:[#allocation8 + $0x30] sm:$0xff]  ;;  %v298_v28 = vld [vmem:[#allocation8 + $0xa8] sm:$0xff] }
  0x54   :  { %658 = vmatprep.subr.mxu0 %v155_v43  ;;  %687 = vmatpush3.msra.mxu1 %v286_v1  ;;  %v315_v27 = vld [vmem:[#allocation8 + $0x130] sm:$0xff]  ;;  %v282_v29 = vld [vmem:[#allocation8 + $0x28] sm:$0xff]  ;;  %v297_v31 = vld [vmem:[#allocation8 + $0xa0] sm:$0xff]  ;;  %vm635_vm3 = vcmp.ne.s32.totalorder %v250_v60, 15 }
  0x55   :  { %659 = vmatpush3.msra.mxu0 %v139_v45  ;;  %688 = vmatprep.subr.mxu1 %v301_v3  ;;  %v314_v30 = vld [vmem:[#allocation8 + $0x128] sm:$0xff]  ;;  %v281_v32 = vld [vmem:[#allocation8 + $0x20] sm:$0xff]  ;;  %v296_v34 = vld [vmem:[#allocation8 + $0x98] sm:$0xff] }
  0x56   :  { %660 = vmatprep.subr.mxu0 %v154_v49  ;;  %689 = vmatpush3.msra.mxu1 %v285_v7  ;;  %v313_v33 = vld [vmem:[#allocation8 + $0x120] sm:$0xff]  ;;  %v280_v35 = vld [vmem:[#allocation8 + $0x18] sm:$0xff]  ;;  %v295_v37 = vld [vmem:[#allocation8 + $0x90] sm:$0xff] }
  0x57   :  { %661 = vmatpush3.msra.mxu0 %v138_v53  ;;  %690 = vmatprep.subr.mxu1 %v300_v21  ;;  %v312_v36 = vld [vmem:[#allocation8 + $0x118] sm:$0xff]  ;;  %v279_v39 = vld [vmem:[#allocation8 + $0x10] sm:$0xff]  ;;  %v294_v42 = vld [vmem:[#allocation8 + $0x88] sm:$0xff] }
  0x58   :  { %662 = vmatprep.subr.mxu0 %v153_v55  ;;  %691 = vmatpush3.msra.mxu1 %v284_v22  ;;  %v311_v40 = vld [vmem:[#allocation8 + $0x110] sm:$0xff]  ;;  %v278_v43 = vld [vmem:[#allocation8 + $0x8] sm:$0xff]  ;;  %v293_v45 = vld [vmem:[#allocation8 + $0x80] sm:$0xff] }
  0x59   :  { %663 = vmatpush3.msra.mxu0 %v137_v57  ;;  %692 = vmatprep.subr.mxu1 %v299_v25  ;;  %v310_v44 = vld [vmem:[#allocation8 + $0x108] sm:$0xff]  ;;  %v277_v46 = vld [vmem:[#allocation8] sm:$0xff]  ;;  %v512_v48 = vld [vmem:[#allocation10 + $0xf8] sm:$0xff] }
  0x5a   :  { %664 = vmatprep.subr.mxu0 %v152_v61  ;;  %693 = vmatpush3.msra.mxu1 %v283_v26  ;;  %v309_v47 = vld [vmem:[#allocation8 + $0x100] sm:$0xff]  ;;  %v628_v50 = vld [vmem:[%s1027_s2] ss:$0 sm:$0xff]  ;;  %v510_v6 = vld [vmem:[#allocation10 + $0xe8] sm:$0xff] }
  0x5b   :  { %665 = vmatpush3.msra.mxu0 %v136_v0  ;;  %694 = vmatprep.subr.mxu1 %v298_v28  ;;  %v509_v7 = vld [vmem:[#allocation10 + $0xe0] sm:$0xff]  ;;  %v499_v8 = vld [vmem:[#allocation10 + $0x90] sm:$0xff]  ;;  %v498_v21 = vld [vmem:[#allocation10 + $0x88] sm:$0xff] }
  0x5c   :  { %666 = vmatprep.subr.mxu0 %v151_v2  ;;  %695 = vmatpush3.msra.mxu1 %v282_v29  ;;  %v497_v22 = vld [vmem:[#allocation10 + $0x80] sm:$0xff]  ;;  %v495_v25 = vld [vmem:[#allocation10 + $0x70] sm:$0xff]  ;;  %v494_v26 = vld [vmem:[#allocation10 + $0x68] sm:$0xff] }
  0x5d   :  { %667 = vmatpush3.msra.mxu0 %v135_v4  ;;  %696 = vmatprep.subr.mxu1 %v297_v31  ;;  %v492_v28 = vld [vmem:[#allocation10 + $0x58] sm:$0xff]  ;;  %v491_v29 = vld [vmem:[#allocation10 + $0x50] sm:$0xff]  ;;  %v489_v31 = vld [vmem:[#allocation10 + $0x40] sm:$0xff] }
  0x5e   :  { %236 = vmatmul.mubr.f32.vlgmr.msra.gmra.mxu0 %v131_v5  ;;  %730 = vmatprep.subr.mxu0 %v324_v10  ;;  %v511_v5 = vld [vmem:[#allocation10 + $0xf0] sm:$0xff] }
  0x5f   :  { %240 = vmatprep.mubr.f32.mxu0 %v134_v9  ;;  %731 = vmatpush3.msra.mxu0 %v324_v10  ;;  %v508_v10 = vld [vmem:[#allocation10 + $0xd8] sm:$0xff] }
  0x60   :  { %732 = vmatprep.subr.mxu0 %v323_v11  ;;  %697 = vmatpush3.msra.mxu1 %v281_v32  ;;  %v488_v32 = vld [vmem:[#allocation10 + $0x38] sm:$0xff] }
  0x61   :  { %733 = vmatpush3.msra.mxu0 %v323_v11  ;;  %698 = vmatprep.subr.mxu1 %v296_v34  ;;  %v507_v11 = vld [vmem:[#allocation10 + $0xd0] sm:$0xff]  ;;  %v486_v34 = vld [vmem:[#allocation10 + $0x28] sm:$0xff] }
  0x62   :  { %241 = vmatmul.mubr.f32.gmra.mxu0 %v133_v12  ;;  %734 = vmatprep.subr.mxu0 %v322_v14  ;;  %v506_v12 = vld [vmem:[#allocation10 + $0xc8] sm:$0xff] }
  0x63   :  { %735 = vmatpush3.msra.mxu0 %v322_v14  ;;  %699 = vmatpush3.msra.mxu1 %v280_v35  ;;  %v505_v14 = vld [vmem:[#allocation10 + $0xc0] sm:$0xff] }
  0x64   :  { %736 = vmatprep.subr.mxu0 %v321_v15  ;;  %700 = vmatprep.subr.mxu1 %v295_v37  ;;  %v485_v35 = vld [vmem:[#allocation10 + $0x20] sm:$0xff]  ;;  %v483_v37 = vld [vmem:[#allocation10 + $0x10] sm:$0xff] }
  0x65   :  { %737 = vmatpush3.msra.mxu0 %v321_v15  ;;  %701 = vmatpush3.msra.mxu1 %v279_v39  ;;  %v504_v15 = vld [vmem:[#allocation10 + $0xb8] sm:$0xff]  ;;  %v482_v39 = vld [vmem:[#allocation10 + $0x8] sm:$0xff] }
  0x66   :  { %738 = vmatprep.subr.mxu0 %v320_v16  ;;  %702 = vmatprep.subr.mxu1 %v294_v42  ;;  %v913_v42 = vmov 0.0  }
  0x67   :  { %739 = vmatpush3.msra.mxu0 %v320_v16  ;;  %703 = vmatpush3.msra.mxu1 %v278_v43  ;;  %v503_v16 = vld [vmem:[#allocation10 + $0xb0] sm:$0xff] }
  0x68   :  { %740 = vmatprep.subr.mxu0 %v319_v18  ;;  %704 = vmatprep.subr.mxu1 %v293_v45 }
  0x69   :  { %741 = vmatpush3.msra.mxu0 %v319_v18  ;;  %705 = vmatpush3.msra.mxu1 %v277_v46  ;;  %v502_v18 = vld [vmem:[#allocation10 + $0xa8] sm:$0xff]  ;;  %v629_v46 = vld [vmem:[%s1027_s2 + $0x1] ss:$0 sm:$0xff]  ;;  %s914_s2 = smov [#allocation11]  }
  0x6a   :  { %742 = vmatprep.subr.mxu0 %v318_v19  ;;  %524 = vmatprep.subr.mxu1 %v512_v48  ;;  %s614_s25 = sshll.u32 %s914_s2, 4  ;;  %s615_s25 = int_to_ptr.vmem [resolvable:$true] %s614_s25 }
  0x6b   :  { %743 = vmatpush3.msra.mxu0 %v318_v19  ;;  %v501_v19 = vld [vmem:[#allocation10 + $0xa0] sm:$0xff]  ;;  %s876_s26 = scalar_lea.vmem %s615_s25, 512  ;;  %p881_p12 = scmp.lt.s32.totalorder %s615_s25, %s615_s25 }
  0x6c   :  { %744 = vmatprep.subr.mxu0 %v317_v20  ;;  %p877_p11 = scmp.ne.s32.totalorder %s615_s25, %s876_s26  ;;  %p882_p13 = scmp.lt.s32.totalorder %s876_s26, %s876_s26 }
  0x6d   :  { %745 = vmatpush3.msra.mxu0 %v317_v20  ;;  %v500_v20 = vld [vmem:[#allocation10 + $0x98] sm:$0xff] }
  0x6e   :  { %746 = vmatprep.subr.mxu0 %v316_v23  ;;  %p883_p0 = por %p882_p13, %p881_p12 }
  0x6f   :  { %747 = vmatpush3.msra.mxu0 %v316_v23  ;;  %v496_v23 = vld [vmem:[#allocation10 + $0x78] sm:$0xff] }
  0x70   :  { %748 = vmatprep.subr.mxu0 %v315_v27  ;;  %p884_p1 = pnand %p883_p0, %p877_p11 }
  0x71   :  { %749 = vmatpush3.msra.mxu0 %v315_v27  ;;  %v493_v27 = vld [vmem:[#allocation10 + $0x60] sm:$0xff] }
  0x72   :  { %750 = vmatprep.subr.mxu0 %v314_v30 }
  0x73   :  { %751 = vmatpush3.msra.mxu0 %v314_v30  ;;  %v490_v30 = vld [vmem:[#allocation10 + $0x48] sm:$0xff] }
  0x74   :  { %752 = vmatprep.subr.mxu0 %v313_v33 }
  0x75   :  { %753 = vmatpush3.msra.mxu0 %v313_v33  ;;  %v487_v33 = vld [vmem:[#allocation10 + $0x30] sm:$0xff] }
  0x76   :  { %754 = vmatprep.subr.mxu0 %v312_v36 }
  0x77   :  { %755 = vmatpush3.msra.mxu0 %v312_v36  ;;  %v484_v36 = vld [vmem:[#allocation10 + $0x18] sm:$0xff] }
  0x78   :  { %756 = vmatprep.subr.mxu0 %v311_v40 }
  0x79   :  { %757 = vmatpush3.msra.mxu0 %v311_v40  ;;  %v481_v40 = vld [vmem:[#allocation10] sm:$0xff] }
  0x7a   :  { %758 = vmatprep.subr.mxu0 %v310_v44 }
  0x7b   :  { %759 = vmatpush3.msra.mxu0 %v310_v44 }
  0x7c   :  { %760 = vmatprep.subr.mxu0 %v309_v47 }
  0x7d   :  { %761 = vmatpush3.msra.mxu0 %v309_v47 }
 0x11e   :  { %v668_v49 = vpop.f32.mrf.mxu0 }
 0x120   :  { %v669_v52 = vpop.f32.mrf.mxu0 }
 0x121   :  { %v670_v53 = vadd.f32 %v669_v52, %v668_v49 }
 0x122   :  { %v671_v54 = vpop.f32.mrf.mxu0 }
 0x123   :  { %v238_v55 = vadd.f32 %v670_v53, %v628_v50 }
 0x124   :  { %v672_v56 = vpop.f32.mrf.mxu0 }
 0x125   :  { %v246_v57 = vmax.f32 %v238_v55, 0.0  ;;  %v673_v58 = vadd.f32 %v672_v56, %v671_v54 }
 0x127   :  { %v243_v59 = vadd.f32 %v673_v58, %v628_v50  ;;  %393 = vmatprep.mubr.f32.mxu1 %v246_v57  ;;  %v253_v62 = vrot.slane %v246_v57, 7  ;;  %v266_v0 = vrot.slane %v246_v57, 1 }
 0x129   :  { %v247_v61 = vmax.f32 %v243_v59, 0.0  ;;  %v98_v59 = vld [vmem:[#allocation5 + $0x2] ss:$4 sm:$0x3] }
 0x12a   :  { %v517_v60 = vrot.slane %v98_v59, %v983_v24 }
 0x12b   :  { %v254_v63 = vrot.slane %v247_v61, 7  ;;  %v267_v1 = vrot.slane %v247_v61, 1 }
 0x12d   :  { %v257_v2 = vsel %vm255_vm0, %v254_v63, %v253_v62  ;;  %v269_v3 = vsel %vm268_vm2, %v266_v0, %v267_v1  ;;  %v270_v4 = vsel %vm268_vm2, %v267_v1, %v266_v0  ;;  %v256_v9 = vsel %vm255_vm0, %v253_v62, %v254_v63 }
 0x12e   :  { %631 = vmatmul.mubr.msk.f32.vlgmr.msra.gmra.mxu1 %vm634_vm1, %v257_v2  ;;  %762 = vmatprep.mubr.f32.mxu0 %v269_v3 }
 0x12f   :  { %398 = vmatprep.mubr.f32.mxu1 %v247_v61  ;;  %763 = vmatmul.mubr.msk.f32.vlgmr.msra.gmra.mxu0 %vm635_vm3, %v270_v4  ;;  %v521_v61 = vrot.slane %v98_v59, %v974_v13 }
 0x130   :  { %525 = vmatpush1.msra.mxu1 %v511_v5 }
 0x131   :  { %526 = vmatprep.subr.mxu1 %v510_v6 }
 0x132   :  { %399 = vmatmul.mubr.f32.gmra.mxu1 %v256_v9 }
 0x133   :  { %527 = vmatpush1.msra.mxu1 %v509_v7  ;;  %588 = vmatprep.mubr.f32.mxu1 %v913_v42 }
 0x134   :  { %528 = vmatprep.subr.mxu1 %v508_v10 }
 0x135   :  { %529 = vmatpush1.msra.mxu1 %v507_v11 }
 0x136   :  { %530 = vmatprep.subr.mxu1 %v506_v12 }
 0x137   :  { %531 = vmatpush1.msra.mxu1 %v505_v14 }
 0x138   :  { %532 = vmatprep.subr.mxu1 %v504_v15 }
 0x139   :  { %533 = vmatpush1.msra.mxu1 %v503_v16 }
 0x13a   :  { %534 = vmatprep.subr.mxu1 %v502_v18 }
 0x13b   :  { %535 = vmatpush1.msra.mxu1 %v501_v19 }
 0x13c   :  { %536 = vmatprep.subr.mxu1 %v500_v20 }
 0x13d   :  { %537 = vmatpush1.msra.mxu1 %v499_v8 }
 0x13e   :  { %538 = vmatprep.subr.mxu1 %v498_v21 }
 0x13f   :  { %539 = vmatpush1.msra.mxu1 %v497_v22 }
 0x140   :  { %540 = vmatprep.subr.mxu1 %v496_v23 }
 0x141   :  { %541 = vmatpush1.msra.mxu1 %v495_v25 }
 0x142   :  { %542 = vmatprep.subr.mxu1 %v494_v26 }
 0x143   :  { %543 = vmatpush1.msra.mxu1 %v493_v27 }
 0x144   :  { %544 = vmatprep.subr.mxu1 %v492_v28 }
 0x145   :  { %545 = vmatpush1.msra.mxu1 %v491_v29 }
 0x146   :  { %546 = vmatprep.subr.mxu1 %v490_v30 }
 0x147   :  { %547 = vmatpush1.msra.mxu1 %v489_v31 }
 0x148   :  { %548 = vmatprep.subr.mxu1 %v488_v32 }
 0x149   :  { %549 = vmatpush1.msra.mxu1 %v487_v33 }
 0x14a   :  { %550 = vmatprep.subr.mxu1 %v486_v34 }
 0x14b   :  { %551 = vmatpush1.msra.mxu1 %v485_v35 }
 0x14c   :  { %552 = vmatprep.subr.mxu1 %v484_v36 }
 0x14d   :  { %553 = vmatpush1.msra.mxu1 %v483_v37 }
 0x14e   :  { %554 = vmatprep.subr.mxu1 %v482_v39 }
 0x14f   :  { %555 = vmatpush1.msra.mxu1 %v481_v40 }
 0x1ee   :  { %v706_v43 = vpop.f32.mrf.mxu1 }
 0x1ef   :  { %v764_v44 = vpop.f32.mrf.mxu0 }
 0x1f0   :  { %v707_v45 = vpop.f32.mrf.mxu1 }
 0x1f1   :  { %v708_v47 = vadd.f32 %v707_v45, %v706_v43  ;;  %v470_v50 = vpop.f32.mrf.mxu0 }
 0x1f2   :  { %v709_v48 = vpop.f32.mrf.mxu1 }
 0x1f3   :  { %v396_v49 = vadd.f32 %v708_v47, %v629_v46 }
 0x1f4   :  { %v710_v52 = vpop.f32.mrf.mxu1 }
 0x1f5   :  { %v471_v53 = vadd.f32 %v470_v50, %v396_v49  ;;  %v711_v54 = vadd.f32 %v710_v52, %v709_v48 }
 0x1f7   :  { %v479_v55 = vmax.f32 %v471_v53, 0.0  ;;  %v401_v56 = vadd.f32 %v711_v54, %v629_v46 }
 0x1f9   :  { %589 = vmatmul.mubr.f32.vlgmr.msra.gmra.mxu1 %v479_v55  ;;  %v476_v57 = vadd.f32 %v764_v44, %v401_v56 }
 0x1fa   :  { %594 = vmatprep.mubr.f32.mxu1 %v913_v42 }
 0x1fb   :  { %v480_v58 = vmax.f32 %v476_v57, 0.0 }
 0x1fd   :  { %595 = vmatmul.mubr.f32.gmra.mxu1 %v480_v58 }
 0x2b9   :  { %v590_v62 = vpop.f32.mrf.mxu1 }
 0x2ba   :  { %v591_v63 = vadd.f32 %v590_v62, %v517_v60 }
 0x2bb   :  { %v592_v0 = vpop.f32.mrf.mxu1 }
 0x2bc   :  { %v601_v1 = vadd.f32 %v591_v63, %v988_v38  ;;  %v593_v2 = vadd.f32 %v592_v0, %v521_v61 }
 0x2bd   :  { %v596_v3 = vpop.f32.mrf.mxu1 }
 0x2be   :  { %605 = vst [vmem:[#allocation11] sm:$0xff] %v601_v1  ;;  %v602_v4 = vadd.f32 %v593_v2, %v976_v17  ;;  %v597_v5 = vadd.f32 %v596_v3, %v517_v60 }
 0x2bf   :  { %v598_v6 = vpop.f32.mrf.mxu1 }
 0x2c0   :  { %606 = vst [vmem:[#allocation11 + $0x8] sm:$0xff] %v602_v4  ;;  %v603_v7 = vadd.f32 %v597_v5, %v995_v51  ;;  %v599_v24 = vadd.f32 %v598_v6, %v521_v61 }
 0x2c2   :  { %607 = vst [vmem:[#allocation11 + $0x10] sm:$0xff] %v603_v7  ;;  %v604_v13 = vadd.f32 %v599_v24, %v990_v41 }
 0x2c4   :  { %608 = vst [vmem:[#allocation11 + $0x18] sm:$0xff] %v604_v13 }
 0x2c5   :  { %887 = shalt.err (!%p884_p1)
}
 0x2c6   :  { %620 = dma.vmem_to_hbm [thread:$0]  %s615_s25, 512, %s1031_s6, [#allocation4], %s909_s11, %s909_s11, %s910_s12  }
 0x2c7   :  { %902 = dma.done.wait [#allocation4], 512  }
 0x2c8   :  { %903 = vsyncadd [#allocation4], 4294966784 }
 0x2c9   :  { %624 = vsyncpa [#allocation3], 1 }
 0x2ca   :  { %625 = vsyncpa [#allocation6], 1 }
 0x2cb   :  { %626 = vsyncpa [#allocation9], 1 }
 0x2cc   :  { %627 = vsyncpa [#allocation4], 1 }

</bundles_post_ra>
